<compile_context>
chip_gen: v7x
topology: tpu7x:2x2x1
jax: 0.10.0
libtpu: 0.0.40
codegen_flags: <defaults>
</compile_context>

<pallas_src>
import functools
import math

import jax
import jax.numpy as jnp
from jax.experimental import pallas as pl
from jax.experimental.pallas import tpu as pltpu


def _round_up(x, m):
    return ((x + m - 1) // m) * m


def _choose_b_tile(B, s_q, target_rows=128):
    """Largest divisor of B whose row slab reaches ~target_rows, but keep >=2 grid
    steps when the batch allows it (v7x megacore shares the 'parallel' axis over 2 TCs)."""
    divisors = [d for d in range(1, B + 1) if B % d == 0]
    reach = [d for d in divisors if d * s_q >= target_rows]
    bt = min(reach) if reach else max(divisors)
    if B // bt < 2:
        smaller = [d for d in divisors if d < bt and B // d >= 2]
        if smaller:
            bt = max(smaller)
    return bt


def mha_kernel(q_ref, k_ref, v_ref, mask_ref,
               wq_ref, bq_ref, wk_ref, bk_ref,
               wv_ref, bv_ref, wo_ref, bo_ref,
               o_ref, ctx_ref,
               *, n_heads, d_k, d_v, b_tile, s_q, s_k):
    f32 = jnp.float32
    bf16 = jnp.bfloat16
    m_q = b_tile * s_q

    # ---- fused all-head projections: one full-width MXU matmul each ----------------
    xq = q_ref[...].astype(bf16)                                   # (m_q, d_model)
    xk = k_ref[...].astype(bf16)                                   # (m_k, d_model)
    xv = v_ref[...].astype(bf16)
    # 1/sqrt(d_k) is already folded into wq/bq.
    q_all = jnp.dot(xq, wq_ref[...], preferred_element_type=f32) + bq_ref[...]   # (m_q, H*d_k)
    k_all = jnp.dot(xk, wk_ref[...], preferred_element_type=f32) + bk_ref[...]   # (m_k, H*d_k)
    v_all = jnp.dot(xv, wv_ref[...], preferred_element_type=f32) + bv_ref[...]   # (m_k, H*d_v)

    # Additive mask bias (int8 0/1 -> f32), computed once for all heads.
    bias = mask_ref[...].astype(f32) * jnp.float32(-1e10)          # (b_tile, s_q, s_k)

    # ---- per-head attention (small static loop) ------------------------------------
    # TODO(synk): at production n_heads / tile sizes switch to lax.fori_loop (or a grid
    # axis over heads) so the unrolled per-head intermediates don't exceed the vreg file.
    for h in range(n_heads):
        qh = q_all[:, h * d_k:(h + 1) * d_k].reshape(b_tile, s_q, d_k).astype(bf16)
        kh = k_all[:, h * d_k:(h + 1) * d_k].reshape(b_tile, s_k, d_k).astype(bf16)
        vh = v_all[:, h * d_v:(h + 1) * d_v].reshape(b_tile, s_k, d_v).astype(bf16)

        # q @ k^T contracting the last dim of both operands (no XLU transpose).
        energy = jnp.einsum("bqd,bkd->bqk", qh, kh,
                            preferred_element_type=f32)            # (b_tile, s_q, s_k)
        energy = energy + bias

        # Numerically-stable softmax in f32; reciprocal goes to the EUP slot.
        energy = energy - jnp.max(energy, axis=-1, keepdims=True)
        p = jnp.exp(energy)
        attn = p * pl.reciprocal(jnp.sum(p, axis=-1, keepdims=True), approx=True)

        ctx_h = jnp.einsum("bqk,bkd->bqd", attn.astype(bf16), vh,
                           preferred_element_type=f32)             # (b_tile, s_q, d_v)
        ctx_ref[:, h * d_v:(h + 1) * d_v] = ctx_h.reshape(m_q, d_v)

    # ---- single fused output projection (lane-dense padded width) ------------------
    out = jnp.dot(ctx_ref[...].astype(bf16), wo_ref[...],
                  preferred_element_type=f32) + bo_ref[...]        # (m_q, d_model_pad)
    o_ref[...] = out.astype(o_ref.dtype)


def multi_head_attention(q, k, v, padding_mask, params, *, n_heads, d_k, d_v):
    """params are PyTorch-layout:
       wq/wk/wv: (n_heads*d_head, d_model), bq/bk/bv: (n_heads*d_head,)
       wo: (d_model, n_heads*d_v),          bo: (d_model,)
    """
    wq, bq, wk, bk, wv, bv, wo, bo = params
    B, s_q, d_model = q.shape
    s_k = k.shape[1]
    assert k.shape == (B, s_k, d_model) and v.shape == (B, s_k, d_model)

    f32, bf16 = jnp.float32, jnp.bfloat16
    scale = 1.0 / math.sqrt(d_k)

    # ---- one-time parameter prep (outside the kernel) -------------------------------
    # PyTorch nn.Linear stores W as (out, in); the kernel wants (in, out), bf16, with the
    # attention scale folded into the Q projection and d_model padded to a lane-dense
    # multiple of 128 on the OUTPUT projection only (padding is sliced off afterwards).
    wq_f = (jnp.asarray(wq).T * scale).astype(bf16)                 # (d_model, H*d_k)
    bq_f = (jnp.asarray(bq) * scale).reshape(1, -1).astype(f32)
    wk_f = jnp.asarray(wk).T.astype(bf16)
    bk_f = jnp.asarray(bk).reshape(1, -1).astype(f32)
    wv_f = jnp.asarray(wv).T.astype(bf16)
    bv_f = jnp.asarray(bv).reshape(1, -1).astype(f32)

    d_model_pad = _round_up(d_model, 128)
    wo_t = jnp.asarray(wo).T.astype(bf16)                           # (H*d_v, d_model)
    wo_f = jnp.zeros((n_heads * d_v, d_model_pad), bf16).at[:, :d_model].set(wo_t)
    bo_f = jnp.zeros((1, d_model_pad), f32).at[:, :d_model].set(jnp.asarray(bo).astype(f32))

    if padding_mask is None:
        padding_mask = jnp.zeros((B, s_q, s_k), jnp.int8)
    mask8 = (padding_mask != 0).astype(jnp.int8)                    # 4x less HBM traffic than int32

    # Flatten batch into the row (sublane) dimension: zero-cost reshapes.
    q2 = q.reshape(B * s_q, d_model)
    k2 = k.reshape(B * s_k, d_model)
    v2 = v.reshape(B * s_k, d_model)

    # Fold several batch elements into each grid step to amortize the ~600-cycle per-step
    # overhead and fill the MXU sublane dimension.
    b_tile = _choose_b_tile(B, s_q)
    grid = (B // b_tile,)

    kernel = functools.partial(mha_kernel, n_heads=n_heads, d_k=d_k, d_v=d_v,
                               b_tile=b_tile, s_q=s_q, s_k=s_k)

    def const_spec(arr):
        return pl.BlockSpec(arr.shape, lambda b: (0,) * arr.ndim)   # grid-invariant, not re-fetched

    flops = (2 * B * (s_q + s_k) * d_model * n_heads * d_k          # Q and K projections
             + 2 * B * s_k * d_model * n_heads * d_v                # V projection
             + 2 * B * n_heads * s_q * s_k * (d_k + d_v)            # q@k^T and attn@v
             + 2 * B * s_q * n_heads * d_v * d_model_pad)           # output projection
    bytes_accessed = (4 * B * (s_q + 2 * s_k) * d_model + B * s_q * s_k
                      + 2 * (wq_f.size + wk_f.size + wv_f.size + wo_f.size)
                      + 4 * (bq_f.size + bk_f.size + bv_f.size + bo_f.size)
                      + 4 * B * s_q * d_model_pad)

    out2 = pl.pallas_call(
        kernel,
        out_shape=jax.ShapeDtypeStruct((B * s_q, d_model_pad), q.dtype),
        grid_spec=pltpu.PrefetchScalarGridSpec(
            num_scalar_prefetch=0,
            grid=grid,
            in_specs=[
                pl.BlockSpec((b_tile * s_q, d_model), lambda b: (b, 0)),   # q slab
                pl.BlockSpec((b_tile * s_k, d_model), lambda b: (b, 0)),   # k slab
                pl.BlockSpec((b_tile * s_k, d_model), lambda b: (b, 0)),   # v slab
                pl.BlockSpec((b_tile, s_q, s_k), lambda b: (b, 0, 0)),     # mask (int8)
                const_spec(wq_f), const_spec(bq_f),
                const_spec(wk_f), const_spec(bk_f),
                const_spec(wv_f), const_spec(bv_f),
                const_spec(wo_f), const_spec(bo_f),
            ],
            out_specs=pl.BlockSpec((b_tile * s_q, d_model_pad), lambda b: (b, 0)),
            scratch_shapes=[pltpu.VMEM((b_tile * s_q, n_heads * d_v), jnp.float32)],
        ),
        compiler_params=pltpu.CompilerParams(dimension_semantics=("parallel",)),
        cost_estimate=pl.CostEstimate(flops=flops,
                                      transcendentals=B * n_heads * s_q * s_k,
                                      bytes_accessed=bytes_accessed),
    )(q2, k2, v2, mask8, wq_f, bq_f, wk_f, bk_f, wv_f, bv_f, wo_f, bo_f)

    # Drop the lane padding and restore (B, S, d_model).
    return out2[:, :d_model].reshape(B, s_q, d_model)


def reference_mha(q, k, v, padding_mask, params, *, n_heads, d_k, d_v):
    """Pure-JAX f32 reference mirroring the PyTorch forward exactly (raw PyTorch params)."""
    wq, bq, wk, bk, wv, bv, wo, bo = params
    B, S, _ = q.shape
    Q = q @ wq.T + bq
    K = k @ wk.T + bk
    V = v @ wv.T + bv
    Q = Q.reshape(B, S, n_heads, d_k).transpose(0, 2, 1, 3)
    K = K.reshape(B, S, n_heads, d_k).transpose(0, 2, 1, 3)
    V = V.reshape(B, S, n_heads, d_v).transpose(0, 2, 1, 3)
    energy = jnp.einsum("bhqd,bhkd->bhqk", Q, K) / math.sqrt(d_k)
    energy = jnp.where(padding_mask[:, None, :, :] != 0, -1e10, energy)
    attn = jax.nn.softmax(energy, axis=-1)
    ctx = jnp.einsum("bhqk,bhkd->bhqd", attn, V)
    ctx = ctx.transpose(0, 2, 1, 3).reshape(B, S, n_heads * d_v)
    return ctx @ wo.T + bo


if __name__ == "__main__":
    B, S, d_model = 2, 8, 32
    d_k, d_v, n_heads = 8, 8, 4

    key = jax.random.PRNGKey(0)
    keys = jax.random.split(key, 12)

    def init_linear(kw, kb, in_f, out_f):
        # PyTorch nn.Linear default init: U(-1/sqrt(in_f), 1/sqrt(in_f))
        bound = 1.0 / math.sqrt(in_f)
        w = jax.random.uniform(kw, (out_f, in_f), jnp.float32, -bound, bound)
        b = jax.random.uniform(kb, (out_f,), jnp.float32, -bound, bound)
        return w, b

    wq, bq = init_linear(keys[0], keys[1], d_model, d_k * n_heads)
    wk, bk = init_linear(keys[2], keys[3], d_model, d_k * n_heads)
    wv, bv = init_linear(keys[4], keys[5], d_model, d_v * n_heads)
    wo, bo = init_linear(keys[6], keys[7], d_v * n_heads, d_model)
    params = (wq, bq, wk, bk, wv, bv, wo, bo)

    q = jax.random.normal(keys[8], (B, S, d_model), jnp.float32)
    k = jax.random.normal(keys[9], (B, S, d_model), jnp.float32)
    v = jax.random.normal(keys[10], (B, S, d_model), jnp.float32)
    padding_mask = (jax.random.uniform(keys[11], (B, S, S)) < 0.2).astype(jnp.int32)

    out = multi_head_attention(q, k, v, padding_mask, params,
                               n_heads=n_heads, d_k=d_k, d_v=d_v)
    out = jax.block_until_ready(out)

    ref = reference_mha(q, k, v, padding_mask, params,
                        n_heads=n_heads, d_k=d_k, d_v=d_v)
    assert out.shape == (B, S, d_model)
    # bf16 MXU inputs (+ EUP approx reciprocal) vs. the f32 reference: ~1e-2 abs error
    # is expected on O(0.3) outputs; 3e-2 tolerance keeps ample margin.
    max_err = float(jnp.max(jnp.abs(out - ref)))
    assert jnp.allclose(out, ref, atol=3e-2, rtol=3e-2), f"mismatch vs reference (max err {max_err})"

    print("KERNEL_OK")
</pallas_src>

<mosaic_0001>
module attributes {stable_mosaic.version = 11 : i64} {
  func.func @mha_kernel(%arg0: i32, %arg1: memref<8x32xf32, #tpu.memory_space<vmem>>, %arg2: memref<8x32xf32, #tpu.memory_space<vmem>>, %arg3: memref<8x32xf32, #tpu.memory_space<vmem>>, %arg4: memref<1x8x8xi8, #tpu.memory_space<vmem>>, %arg5: memref<32x32xbf16, #tpu.memory_space<vmem>>, %arg6: memref<1x32xf32, #tpu.memory_space<vmem>>, %arg7: memref<32x32xbf16, #tpu.memory_space<vmem>>, %arg8: memref<1x32xf32, #tpu.memory_space<vmem>>, %arg9: memref<32x32xbf16, #tpu.memory_space<vmem>>, %arg10: memref<1x32xf32, #tpu.memory_space<vmem>>, %arg11: memref<32x128xbf16, #tpu.memory_space<vmem>>, %arg12: memref<1x128xf32, #tpu.memory_space<vmem>>, %arg13: memref<8x128xf32, #tpu.memory_space<vmem>>, %arg14: memref<8x32xf32, #tpu.memory_space<vmem>>) attributes {dimension_semantics = [#tpu.dimension_semantics<parallel>], iteration_bounds = array<i64: 2>, scalar_prefetch = 0 : i64, scratch_operands = 1 : i64, tpu.core_type = #tpu.core_type<tc>, window_params = [{transform_indices = @transform_0, window_bounds = array<i64: 8, 32>}, {transform_indices = @transform_1, window_bounds = array<i64: 8, 32>}, {transform_indices = @transform_2, window_bounds = array<i64: 8, 32>}, {transform_indices = @transform_3, window_bounds = array<i64: 1, 8, 8>}, {pipeline_mode = #tpu.pipeline_mode<synchronous>, transform_indices = @transform_4, window_bounds = array<i64: 32, 32>}, {pipeline_mode = #tpu.pipeline_mode<synchronous>, transform_indices = @transform_5, window_bounds = array<i64: 1, 32>}, {pipeline_mode = #tpu.pipeline_mode<synchronous>, transform_indices = @transform_6, window_bounds = array<i64: 32, 32>}, {pipeline_mode = #tpu.pipeline_mode<synchronous>, transform_indices = @transform_7, window_bounds = array<i64: 1, 32>}, {pipeline_mode = #tpu.pipeline_mode<synchronous>, transform_indices = @transform_8, window_bounds = array<i64: 32, 32>}, {pipeline_mode = #tpu.pipeline_mode<synchronous>, transform_indices = @transform_9, window_bounds = array<i64: 1, 32>}, {pipeline_mode = #tpu.pipeline_mode<synchronous>, transform_indices = @transform_10, window_bounds = array<i64: 32, 128>}, {pipeline_mode = #tpu.pipeline_mode<synchronous>, transform_indices = @transform_11, window_bounds = array<i64: 1, 128>}, {transform_indices = @transform_12, window_bounds = array<i64: 8, 128>}]} {
    %c0 = arith.constant 0 : index
    %c0_0 = arith.constant 0 : index
    %0 = vector.load %arg1[%c0, %c0_0] : memref<8x32xf32, #tpu.memory_space<vmem>>, vector<8x32xf32>
    %1 = arith.truncf %0 : vector<8x32xf32> to vector<8x32xbf16>
    %c0_1 = arith.constant 0 : index
    %c0_2 = arith.constant 0 : index
    %2 = vector.load %arg2[%c0_1, %c0_2] : memref<8x32xf32, #tpu.memory_space<vmem>>, vector<8x32xf32>
    %3 = arith.truncf %2 : vector<8x32xf32> to vector<8x32xbf16>
    %c0_3 = arith.constant 0 : index
    %c0_4 = arith.constant 0 : index
    %4 = vector.load %arg3[%c0_3, %c0_4] : memref<8x32xf32, #tpu.memory_space<vmem>>, vector<8x32xf32>
    %5 = arith.truncf %4 : vector<8x32xf32> to vector<8x32xbf16>
    %c0_5 = arith.constant 0 : index
    %c0_6 = arith.constant 0 : index
    %6 = vector.load %arg5[%c0_5, %c0_6] : memref<32x32xbf16, #tpu.memory_space<vmem>>, vector<32x32xbf16>
    %cst = arith.constant dense<0.000000e+00> : vector<8x32xf32>
    %7 = tpu.matmul %1, %6, %cst {dimension_numbers = #tpu.dot_dimension_numbers<[1], [0], [0], [1], [0, 0, 1, 1], [], []>} : vector<8x32xbf16>, vector<32x32xbf16>, vector<8x32xf32> -> vector<8x32xf32>
    %c0_7 = arith.constant 0 : index
    %c0_8 = arith.constant 0 : index
    %8 = vector.load %arg6[%c0_7, %c0_8] : memref<1x32xf32, #tpu.memory_space<vmem>>, vector<1x32xf32>
    %9 = vector.broadcast %8 : vector<1x32xf32> to vector<8x32xf32>
    %10 = arith.addf %7, %9 : vector<8x32xf32>
    %c0_9 = arith.constant 0 : index
    %c0_10 = arith.constant 0 : index
    %11 = vector.load %arg7[%c0_9, %c0_10] : memref<32x32xbf16, #tpu.memory_space<vmem>>, vector<32x32xbf16>
    %cst_11 = arith.constant dense<0.000000e+00> : vector<8x32xf32>
    %12 = tpu.matmul %3, %11, %cst_11 {dimension_numbers = #tpu.dot_dimension_numbers<[1], [0], [0], [1], [0, 0, 1, 1], [], []>} : vector<8x32xbf16>, vector<32x32xbf16>, vector<8x32xf32> -> vector<8x32xf32>
    %c0_12 = arith.constant 0 : index
    %c0_13 = arith.constant 0 : index
    %13 = vector.load %arg8[%c0_12, %c0_13] : memref<1x32xf32, #tpu.memory_space<vmem>>, vector<1x32xf32>
    %14 = vector.broadcast %13 : vector<1x32xf32> to vector<8x32xf32>
    %15 = arith.addf %12, %14 : vector<8x32xf32>
    %c0_14 = arith.constant 0 : index
    %c0_15 = arith.constant 0 : index
    %16 = vector.load %arg9[%c0_14, %c0_15] : memref<32x32xbf16, #tpu.memory_space<vmem>>, vector<32x32xbf16>
    %cst_16 = arith.constant dense<0.000000e+00> : vector<8x32xf32>
    %17 = tpu.matmul %5, %16, %cst_16 {dimension_numbers = #tpu.dot_dimension_numbers<[1], [0], [0], [1], [0, 0, 1, 1], [], []>} : vector<8x32xbf16>, vector<32x32xbf16>, vector<8x32xf32> -> vector<8x32xf32>
    %c0_17 = arith.constant 0 : index
    %c0_18 = arith.constant 0 : index
    %18 = vector.load %arg10[%c0_17, %c0_18] : memref<1x32xf32, #tpu.memory_space<vmem>>, vector<1x32xf32>
    %19 = vector.broadcast %18 : vector<1x32xf32> to vector<8x32xf32>
    %20 = arith.addf %17, %19 : vector<8x32xf32>
    %c0_19 = arith.constant 0 : index
    %c0_20 = arith.constant 0 : index
    %c0_21 = arith.constant 0 : index
    %21 = vector.load %arg4[%c0_19, %c0_20, %c0_21] : memref<1x8x8xi8, #tpu.memory_space<vmem>>, vector<1x8x8xi8>
    %22 = arith.sitofp %21 : vector<1x8x8xi8> to vector<1x8x8xf32>
    %cst_22 = arith.constant -1.000000e+10 : f32
    %23 = vector.broadcast %cst_22 : f32 to vector<1x8x8xf32>
    %24 = arith.mulf %22, %23 : vector<1x8x8xf32>
    %25 = vector.extract_strided_slice %10 {offsets = [0, 0], sizes = [8, 8], strides = [1, 1]} : vector<8x32xf32> to vector<8x8xf32>
    %26 = vector.shape_cast %25 : vector<8x8xf32> to vector<1x8x8xf32>
    %27 = arith.truncf %26 : vector<1x8x8xf32> to vector<1x8x8xbf16>
    %28 = vector.extract_strided_slice %15 {offsets = [0, 0], sizes = [8, 8], strides = [1, 1]} : vector<8x32xf32> to vector<8x8xf32>
    %29 = vector.shape_cast %28 : vector<8x8xf32> to vector<1x8x8xf32>
    %30 = arith.truncf %29 : vector<1x8x8xf32> to vector<1x8x8xbf16>
    %31 = vector.extract_strided_slice %20 {offsets = [0, 0], sizes = [8, 8], strides = [1, 1]} : vector<8x32xf32> to vector<8x8xf32>
    %32 = vector.shape_cast %31 : vector<8x8xf32> to vector<1x8x8xf32>
    %33 = arith.truncf %32 : vector<1x8x8xf32> to vector<1x8x8xbf16>
    "tpu.trace_start"() <{level = 10 : i32, message = "bqd,bkd->bqk"}> : () -> ()
    %cst_23 = arith.constant dense<0.000000e+00> : vector<1x8x8xf32>
    %34 = tpu.matmul %27, %30, %cst_23 {dimension_numbers = #tpu.dot_dimension_numbers<[2], [2], [1], [1], [0, 0, 0, 1, 1, 1], [0], [0]>} : vector<1x8x8xbf16>, vector<1x8x8xbf16>, vector<1x8x8xf32> -> vector<1x8x8xf32>
    "tpu.trace_stop"() : () -> ()
    %35 = arith.addf %34, %24 : vector<1x8x8xf32>
    %cst_24 = arith.constant dense<0xFF800000> : vector<1x8xf32>
    %36 = vector.multi_reduction <maximumf>, %35, %cst_24 [2] : vector<1x8x8xf32> to vector<1x8xf32>
    %37 = vector.shape_cast %36 : vector<1x8xf32> to vector<1x8x1xf32>
    %38 = vector.broadcast %37 : vector<1x8x1xf32> to vector<1x8x8xf32>
    %39 = arith.subf %35, %38 : vector<1x8x8xf32>
    %40 = math.exp %39 : vector<1x8x8xf32>
    %cst_25 = arith.constant dense<0.000000e+00> : vector<1x8xf32>
    %41 = vector.multi_reduction <add>, %40, %cst_25 [2] : vector<1x8x8xf32> to vector<1x8xf32>
    %42 = vector.shape_cast %41 : vector<1x8xf32> to vector<1x8x1xf32>
    %43 = tpu.reciprocal %42 {approx = true} : vector<1x8x1xf32> -> vector<1x8x1xf32>
    %44 = vector.broadcast %43 : vector<1x8x1xf32> to vector<1x8x8xf32>
    %45 = arith.mulf %40, %44 : vector<1x8x8xf32>
    %46 = arith.truncf %45 : vector<1x8x8xf32> to vector<1x8x8xbf16>
    "tpu.trace_start"() <{level = 10 : i32, message = "bqk,bkd->bqd"}> : () -> ()
    %cst_26 = arith.constant dense<0.000000e+00> : vector<1x8x8xf32>
    %47 = tpu.matmul %46, %33, %cst_26 {dimension_numbers = #tpu.dot_dimension_numbers<[2], [1], [1], [2], [0, 0, 0, 1, 1, 2], [0], [0]>} : vector<1x8x8xbf16>, vector<1x8x8xbf16>, vector<1x8x8xf32> -> vector<1x8x8xf32>
    "tpu.trace_stop"() : () -> ()
    %48 = vector.shape_cast %47 : vector<1x8x8xf32> to vector<8x8xf32>
    %c0_27 = arith.constant 0 : index
    %c0_28 = arith.constant 0 : index
    %49 = vector.load %arg14[%c0_27, %c0_28] : memref<8x32xf32, #tpu.memory_space<vmem>>, vector<8x8xf32>
    tpu.vector_store %arg14[%c0_27, %c0_28], %48 {strides = array<i32>} : memref<8x32xf32, #tpu.memory_space<vmem>>, vector<8x8xf32>,
    %50 = vector.extract_strided_slice %10 {offsets = [0, 8], sizes = [8, 8], strides = [1, 1]} : vector<8x32xf32> to vector<8x8xf32>
    %51 = vector.shape_cast %50 : vector<8x8xf32> to vector<1x8x8xf32>
    %52 = arith.truncf %51 : vector<1x8x8xf32> to vector<1x8x8xbf16>
    %53 = vector.extract_strided_slice %15 {offsets = [0, 8], sizes = [8, 8], strides = [1, 1]} : vector<8x32xf32> to vector<8x8xf32>
    %54 = vector.shape_cast %53 : vector<8x8xf32> to vector<1x8x8xf32>
    %55 = arith.truncf %54 : vector<1x8x8xf32> to vector<1x8x8xbf16>
    %56 = vector.extract_strided_slice %20 {offsets = [0, 8], sizes = [8, 8], strides = [1, 1]} : vector<8x32xf32> to vector<8x8xf32>
    %57 = vector.shape_cast %56 : vector<8x8xf32> to vector<1x8x8xf32>
    %58 = arith.truncf %57 : vector<1x8x8xf32> to vector<1x8x8xbf16>
    "tpu.trace_start"() <{level = 10 : i32, message = "bqd,bkd->bqk"}> : () -> ()
    %cst_29 = arith.constant dense<0.000000e+00> : vector<1x8x8xf32>
    %59 = tpu.matmul %52, %55, %cst_29 {dimension_numbers = #tpu.dot_dimension_numbers<[2], [2], [1], [1], [0, 0, 0, 1, 1, 1], [0], [0]>} : vector<1x8x8xbf16>, vector<1x8x8xbf16>, vector<1x8x8xf32> -> vector<1x8x8xf32>
    "tpu.trace_stop"() : () -> ()
    %60 = arith.addf %59, %24 : vector<1x8x8xf32>
    %cst_30 = arith.constant dense<0xFF800000> : vector<1x8xf32>
    %61 = vector.multi_reduction <maximumf>, %60, %cst_30 [2] : vector<1x8x8xf32> to vector<1x8xf32>
    %62 = vector.shape_cast %61 : vector<1x8xf32> to vector<1x8x1xf32>
    %63 = vector.broadcast %62 : vector<1x8x1xf32> to vector<1x8x8xf32>
    %64 = arith.subf %60, %63 : vector<1x8x8xf32>
    %65 = math.exp %64 : vector<1x8x8xf32>
    %cst_31 = arith.constant dense<0.000000e+00> : vector<1x8xf32>
    %66 = vector.multi_reduction <add>, %65, %cst_31 [2] : vector<1x8x8xf32> to vector<1x8xf32>
    %67 = vector.shape_cast %66 : vector<1x8xf32> to vector<1x8x1xf32>
    %68 = tpu.reciprocal %67 {approx = true} : vector<1x8x1xf32> -> vector<1x8x1xf32>
    %69 = vector.broadcast %68 : vector<1x8x1xf32> to vector<1x8x8xf32>
    %70 = arith.mulf %65, %69 : vector<1x8x8xf32>
    %71 = arith.truncf %70 : vector<1x8x8xf32> to vector<1x8x8xbf16>
    "tpu.trace_start"() <{level = 10 : i32, message = "bqk,bkd->bqd"}> : () -> ()
    %cst_32 = arith.constant dense<0.000000e+00> : vector<1x8x8xf32>
    %72 = tpu.matmul %71, %58, %cst_32 {dimension_numbers = #tpu.dot_dimension_numbers<[2], [1], [1], [2], [0, 0, 0, 1, 1, 2], [0], [0]>} : vector<1x8x8xbf16>, vector<1x8x8xbf16>, vector<1x8x8xf32> -> vector<1x8x8xf32>
    "tpu.trace_stop"() : () -> ()
    %73 = vector.shape_cast %72 : vector<1x8x8xf32> to vector<8x8xf32>
    %c0_33 = arith.constant 0 : index
    %c8 = arith.constant 8 : index
    %74 = vector.load %arg14[%c0_33, %c8] : memref<8x32xf32, #tpu.memory_space<vmem>>, vector<8x8xf32>
    tpu.vector_store %arg14[%c0_33, %c8], %73 {strides = array<i32>} : memref<8x32xf32, #tpu.memory_space<vmem>>, vector<8x8xf32>,
    %75 = vector.extract_strided_slice %10 {offsets = [0, 16], sizes = [8, 8], strides = [1, 1]} : vector<8x32xf32> to vector<8x8xf32>
    %76 = vector.shape_cast %75 : vector<8x8xf32> to vector<1x8x8xf32>
    %77 = arith.truncf %76 : vector<1x8x8xf32> to vector<1x8x8xbf16>
    %78 = vector.extract_strided_slice %15 {offsets = [0, 16], sizes = [8, 8], strides = [1, 1]} : vector<8x32xf32> to vector<8x8xf32>
    %79 = vector.shape_cast %78 : vector<8x8xf32> to vector<1x8x8xf32>
    %80 = arith.truncf %79 : vector<1x8x8xf32> to vector<1x8x8xbf16>
    %81 = vector.extract_strided_slice %20 {offsets = [0, 16], sizes = [8, 8], strides = [1, 1]} : vector<8x32xf32> to vector<8x8xf32>
    %82 = vector.shape_cast %81 : vector<8x8xf32> to vector<1x8x8xf32>
    %83 = arith.truncf %82 : vector<1x8x8xf32> to vector<1x8x8xbf16>
    "tpu.trace_start"() <{level = 10 : i32, message = "bqd,bkd->bqk"}> : () -> ()
    %cst_34 = arith.constant dense<0.000000e+00> : vector<1x8x8xf32>
    %84 = tpu.matmul %77, %80, %cst_34 {dimension_numbers = #tpu.dot_dimension_numbers<[2], [2], [1], [1], [0, 0, 0, 1, 1, 1], [0], [0]>} : vector<1x8x8xbf16>, vector<1x8x8xbf16>, vector<1x8x8xf32> -> vector<1x8x8xf32>
    "tpu.trace_stop"() : () -> ()
    %85 = arith.addf %84, %24 : vector<1x8x8xf32>
    %cst_35 = arith.constant dense<0xFF800000> : vector<1x8xf32>
    %86 = vector.multi_reduction <maximumf>, %85, %cst_35 [2] : vector<1x8x8xf32> to vector<1x8xf32>
    %87 = vector.shape_cast %86 : vector<1x8xf32> to vector<1x8x1xf32>
    %88 = vector.broadcast %87 : vector<1x8x1xf32> to vector<1x8x8xf32>
    %89 = arith.subf %85, %88 : vector<1x8x8xf32>
    %90 = math.exp %89 : vector<1x8x8xf32>
    %cst_36 = arith.constant dense<0.000000e+00> : vector<1x8xf32>
    %91 = vector.multi_reduction <add>, %90, %cst_36 [2] : vector<1x8x8xf32> to vector<1x8xf32>
    %92 = vector.shape_cast %91 : vector<1x8xf32> to vector<1x8x1xf32>
    %93 = tpu.reciprocal %92 {approx = true} : vector<1x8x1xf32> -> vector<1x8x1xf32>
    %94 = vector.broadcast %93 : vector<1x8x1xf32> to vector<1x8x8xf32>
    %95 = arith.mulf %90, %94 : vector<1x8x8xf32>
    %96 = arith.truncf %95 : vector<1x8x8xf32> to vector<1x8x8xbf16>
    "tpu.trace_start"() <{level = 10 : i32, message = "bqk,bkd->bqd"}> : () -> ()
    %cst_37 = arith.constant dense<0.000000e+00> : vector<1x8x8xf32>
    %97 = tpu.matmul %96, %83, %cst_37 {dimension_numbers = #tpu.dot_dimension_numbers<[2], [1], [1], [2], [0, 0, 0, 1, 1, 2], [0], [0]>} : vector<1x8x8xbf16>, vector<1x8x8xbf16>, vector<1x8x8xf32> -> vector<1x8x8xf32>
    "tpu.trace_stop"() : () -> ()
    %98 = vector.shape_cast %97 : vector<1x8x8xf32> to vector<8x8xf32>
    %c0_38 = arith.constant 0 : index
    %c16 = arith.constant 16 : index
    %99 = vector.load %arg14[%c0_38, %c16] : memref<8x32xf32, #tpu.memory_space<vmem>>, vector<8x8xf32>
    tpu.vector_store %arg14[%c0_38, %c16], %98 {strides = array<i32>} : memref<8x32xf32, #tpu.memory_space<vmem>>, vector<8x8xf32>,
    %100 = vector.extract_strided_slice %10 {offsets = [0, 24], sizes = [8, 8], strides = [1, 1]} : vector<8x32xf32> to vector<8x8xf32>
    %101 = vector.shape_cast %100 : vector<8x8xf32> to vector<1x8x8xf32>
    %102 = arith.truncf %101 : vector<1x8x8xf32> to vector<1x8x8xbf16>
    %103 = vector.extract_strided_slice %15 {offsets = [0, 24], sizes = [8, 8], strides = [1, 1]} : vector<8x32xf32> to vector<8x8xf32>
    %104 = vector.shape_cast %103 : vector<8x8xf32> to vector<1x8x8xf32>
    %105 = arith.truncf %104 : vector<1x8x8xf32> to vector<1x8x8xbf16>
    %106 = vector.extract_strided_slice %20 {offsets = [0, 24], sizes = [8, 8], strides = [1, 1]} : vector<8x32xf32> to vector<8x8xf32>
    %107 = vector.shape_cast %106 : vector<8x8xf32> to vector<1x8x8xf32>
    %108 = arith.truncf %107 : vector<1x8x8xf32> to vector<1x8x8xbf16>
    "tpu.trace_start"() <{level = 10 : i32, message = "bqd,bkd->bqk"}> : () -> ()
    %cst_39 = arith.constant dense<0.000000e+00> : vector<1x8x8xf32>
    %109 = tpu.matmul %102, %105, %cst_39 {dimension_numbers = #tpu.dot_dimension_numbers<[2], [2], [1], [1], [0, 0, 0, 1, 1, 1], [0], [0]>} : vector<1x8x8xbf16>, vector<1x8x8xbf16>, vector<1x8x8xf32> -> vector<1x8x8xf32>
    "tpu.trace_stop"() : () -> ()
    %110 = arith.addf %109, %24 : vector<1x8x8xf32>
    %cst_40 = arith.constant dense<0xFF800000> : vector<1x8xf32>
    %111 = vector.multi_reduction <maximumf>, %110, %cst_40 [2] : vector<1x8x8xf32> to vector<1x8xf32>
    %112 = vector.shape_cast %111 : vector<1x8xf32> to vector<1x8x1xf32>
    %113 = vector.broadcast %112 : vector<1x8x1xf32> to vector<1x8x8xf32>
    %114 = arith.subf %110, %113 : vector<1x8x8xf32>
    %115 = math.exp %114 : vector<1x8x8xf32>
    %cst_41 = arith.constant dense<0.000000e+00> : vector<1x8xf32>
    %116 = vector.multi_reduction <add>, %115, %cst_41 [2] : vector<1x8x8xf32> to vector<1x8xf32>
    %117 = vector.shape_cast %116 : vector<1x8xf32> to vector<1x8x1xf32>
    %118 = tpu.reciprocal %117 {approx = true} : vector<1x8x1xf32> -> vector<1x8x1xf32>
    %119 = vector.broadcast %118 : vector<1x8x1xf32> to vector<1x8x8xf32>
    %120 = arith.mulf %115, %119 : vector<1x8x8xf32>
    %121 = arith.truncf %120 : vector<1x8x8xf32> to vector<1x8x8xbf16>
    "tpu.trace_start"() <{level = 10 : i32, message = "bqk,bkd->bqd"}> : () -> ()
    %cst_42 = arith.constant dense<0.000000e+00> : vector<1x8x8xf32>
    %122 = tpu.matmul %121, %108, %cst_42 {dimension_numbers = #tpu.dot_dimension_numbers<[2], [1], [1], [2], [0, 0, 0, 1, 1, 2], [0], [0]>} : vector<1x8x8xbf16>, vector<1x8x8xbf16>, vector<1x8x8xf32> -> vector<1x8x8xf32>
    "tpu.trace_stop"() : () -> ()
    %123 = vector.shape_cast %122 : vector<1x8x8xf32> to vector<8x8xf32>
    %c0_43 = arith.constant 0 : index
    %c24 = arith.constant 24 : index
    %124 = vector.load %arg14[%c0_43, %c24] : memref<8x32xf32, #tpu.memory_space<vmem>>, vector<8x8xf32>
    tpu.vector_store %arg14[%c0_43, %c24], %123 {strides = array<i32>} : memref<8x32xf32, #tpu.memory_space<vmem>>, vector<8x8xf32>,
    %c0_44 = arith.constant 0 : index
    %c0_45 = arith.constant 0 : index
    %125 = vector.load %arg14[%c0_44, %c0_45] : memref<8x32xf32, #tpu.memory_space<vmem>>, vector<8x32xf32>
    %126 = arith.truncf %125 : vector<8x32xf32> to vector<8x32xbf16>
    %c0_46 = arith.constant 0 : index
    %c0_47 = arith.constant 0 : index
    %127 = vector.load %arg11[%c0_46, %c0_47] : memref<32x128xbf16, #tpu.memory_space<vmem>>, vector<32x128xbf16>
    %cst_48 = arith.constant dense<0.000000e+00> : vector<8x128xf32>
    %128 = tpu.matmul %126, %127, %cst_48 {dimension_numbers = #tpu.dot_dimension_numbers<[1], [0], [0], [1], [0, 0, 1, 1], [], []>} : vector<8x32xbf16>, vector<32x128xbf16>, vector<8x128xf32> -> vector<8x128xf32>
    %c0_49 = arith.constant 0 : index
    %c0_50 = arith.constant 0 : index
    %129 = vector.load %arg12[%c0_49, %c0_50] : memref<1x128xf32, #tpu.memory_space<vmem>>, vector<1x128xf32>
    %130 = vector.broadcast %129 : vector<1x128xf32> to vector<8x128xf32>
    %131 = arith.addf %128, %130 : vector<8x128xf32>
    %c0_51 = arith.constant 0 : index
    %c0_52 = arith.constant 0 : index
    %132 = vector.load %arg13[%c0_51, %c0_52] : memref<8x128xf32, #tpu.memory_space<vmem>>, vector<8x128xf32>
    tpu.vector_store %arg13[%c0_51, %c0_52], %131 {strides = array<i32>} : memref<8x128xf32, #tpu.memory_space<vmem>>, vector<8x128xf32>,
    return
  }
  func.func @transform_0(%arg0: i32) -> (i32, i32) {
    %c0_i32 = arith.constant 0 : i32
    %c0_i32_0 = arith.constant 0 : i32
    return %arg0, %c0_i32 : i32, i32
  }
  func.func @transform_1(%arg0: i32) -> (i32, i32) {
    %c0_i32 = arith.constant 0 : i32
    %c0_i32_0 = arith.constant 0 : i32
    return %arg0, %c0_i32 : i32, i32
  }
  func.func @transform_2(%arg0: i32) -> (i32, i32) {
    %c0_i32 = arith.constant 0 : i32
    %c0_i32_0 = arith.constant 0 : i32
    return %arg0, %c0_i32 : i32, i32
  }
  func.func @transform_3(%arg0: i32) -> (i32, i32, i32) {
    %c0_i32 = arith.constant 0 : i32
    %c0_i32_0 = arith.constant 0 : i32
    %c0_i32_1 = arith.constant 0 : i32
    return %arg0, %c0_i32, %c0_i32_0 : i32, i32, i32
  }
  func.func @transform_4(%arg0: i32) -> (i32, i32) {
    %c0_i32 = arith.constant 0 : i32
    %c0_i32_0 = arith.constant 0 : i32
    %c0_i32_1 = arith.constant 0 : i32
    return %c0_i32, %c0_i32_0 : i32, i32
  }
  func.func @transform_5(%arg0: i32) -> (i32, i32) {
    %c0_i32 = arith.constant 0 : i32
    %c0_i32_0 = arith.constant 0 : i32
    %c0_i32_1 = arith.constant 0 : i32
    return %c0_i32, %c0_i32_0 : i32, i32
  }
  func.func @transform_6(%arg0: i32) -> (i32, i32) {
    %c0_i32 = arith.constant 0 : i32
    %c0_i32_0 = arith.constant 0 : i32
    %c0_i32_1 = arith.constant 0 : i32
    return %c0_i32, %c0_i32_0 : i32, i32
  }
  func.func @transform_7(%arg0: i32) -> (i32, i32) {
    %c0_i32 = arith.constant 0 : i32
    %c0_i32_0 = arith.constant 0 : i32
    %c0_i32_1 = arith.constant 0 : i32
    return %c0_i32, %c0_i32_0 : i32, i32
  }
  func.func @transform_8(%arg0: i32) -> (i32, i32) {
    %c0_i32 = arith.constant 0 : i32
    %c0_i32_0 = arith.constant 0 : i32
    %c0_i32_1 = arith.constant 0 : i32
    return %c0_i32, %c0_i32_0 : i32, i32
  }
  func.func @transform_9(%arg0: i32) -> (i32, i32) {
    %c0_i32 = arith.constant 0 : i32
    %c0_i32_0 = arith.constant 0 : i32
    %c0_i32_1 = arith.constant 0 : i32
    return %c0_i32, %c0_i32_0 : i32, i32
  }
  func.func @transform_10(%arg0: i32) -> (i32, i32) {
    %c0_i32 = arith.constant 0 : i32
    %c0_i32_0 = arith.constant 0 : i32
    %c0_i32_1 = arith.constant 0 : i32
    return %c0_i32, %c0_i32_0 : i32, i32
  }
  func.func @transform_11(%arg0: i32) -> (i32, i32) {
    %c0_i32 = arith.constant 0 : i32
    %c0_i32_0 = arith.constant 0 : i32
    %c0_i32_1 = arith.constant 0 : i32
    return %c0_i32, %c0_i32_0 : i32, i32
  }
  func.func @transform_12(%arg0: i32) -> (i32, i32) {
    %c0_i32 = arith.constant 0 : i32
    %c0_i32_0 = arith.constant 0 : i32
    return %arg0, %c0_i32 : i32, i32
  }
}

</mosaic_0001>

<bundles_post_ra>
// kernel: tpu_custom_call.1
= control target key start
LH: loop header
LB: loop body
LE: loop exit
PB: predicated region body
PF: predicated region fallthrough
CT: control target
= control target key end

     0   :  { %s2620_s0 = inlined_call_operand.hbm [shape: f32[16,32], index: 0, kind: input, shape index: {}]   ;;  %s2621_s1 = inlined_call_operand.hbm [shape: f32[16,32], index: 1, kind: input, shape index: {}]   ;;  %s2622_s2 = inlined_call_operand.hbm [shape: f32[16,32], index: 2, kind: input, shape index: {}]   ;;  %s2623_s3 = inlined_call_operand.hbm [shape: s8[2,8,8], index: 3, kind: input, shape index: {}]   ;;  %s2624_s4 = inlined_call_operand.hbm [shape: bf16[32,32], index: 4, kind: input, shape index: {}]   ;;  %s2625_s5 = inlined_call_operand.vmem [shape: f32[1,32], index: 5, kind: input, shape index: {}]   ;;  %s2626_s6 = inlined_call_operand.vmem [shape: bf16[32,32], index: 6, kind: input, shape index: {}]   ;;  %s2627_s7 = inlined_call_operand.vmem [shape: f32[1,32], index: 7, kind: input, shape index: {}]   ;;  %s2628_s8 = inlined_call_operand.hbm [shape: bf16[32,32], index: 8, kind: input, shape index: {}]   ;;  %s2629_s9 = inlined_call_operand.hbm [shape: f32[1,32], index: 9, kind: input, shape index: {}]   ;;  %s2630_s10 = inlined_call_operand.vmem [shape: bf16[32,128], index: 10, kind: input, shape index: {}]   ;;  %s2631_s11 = inlined_call_operand.vmem [shape: f32[1,128], index: 11, kind: input, shape index: {}]   ;;  %s2632_s12 = inlined_call_operand.hbm [shape: f32[16,128], index: 12, kind: output, shape index: {}]  }
   0x1   :  { %2652 = sst [smem:[#allocation28_spill]] %s2621_s1 }
   0x2   :  { %2653 = sst [smem:[#allocation29_spill]] %s2624_s4 }
   0x3   :  { %2654 = sst [smem:[#allocation30_spill]] %s2628_s8 }
   0x4   :  { %2655 = sst [smem:[#allocation31_spill]] %s2630_s10 }
   0x5   :  { %2656 = sst [smem:[#allocation32_spill]] %s2631_s11 }
   0x6   :  { %2657 = sst [smem:[#allocation33_spill]] %s2632_s12 }
   0x7   :  { %17 = vsyncpa [#allocation4], 0 }
   0x8   :  { %19 = vsyncpa [#allocation4 + $0x1], 0 }
   0x9   :  { %20 = vsyncpa [#allocation7], 0 }
   0xa   :  { %22 = vsyncpa [#allocation7 + $0x1], 0 }
   0xb   :  { %23 = vsyncpa [#allocation10], 0 }
   0xc   :  { %25 = vsyncpa [#allocation10 + $0x1], 0 }
   0xd   :  { %26 = vsyncpa [#allocation13], 0 }
   0xe   :  { %27 = vsyncpa [#allocation5], 0 }
   0xf   :  { %29 = vsyncpa [#allocation5 + $0x1], 0  ;;  %s2152_s21 = smov 0   ;;  %s2154_s22 = smov 0  }
  0x10   :  { %s2156_s23 = smov 0   ;;  %s2158_s24 = smov 0  }
  0x11 LB: > { %2658 = sst [smem:[#allocation22_spill]] %s2055_s21  ;;  %s2173_s25 = sadd.s32 4294967295, %s2067_s24   ;;  %s2067_s24 = sphi %s2158_s24, %s2698_s24   ;;  %s2063_s23 = sphi %s2156_s23, %s2700_s23   ;;  %s2059_s22 = sphi %s2154_s22, %s2702_s22   ;;  %s2055_s21 = sphi %s2152_s21, %s2701_s21  }
  0x12   : > { %2659 = sst [smem:[#allocation23_spill]] %s2063_s23  ;;  %s1496_s26 = sadd.s32 4294967294, %s2067_s24  }
  0x13   : > { %p55_p0 = scmp.ne.s32.totalorder %s2059_s22, %s2055_s21  ;;  %p2634_p1 = scmp.eq.s32.totalorder %s2173_s25, 0 }
  0x14   : > { %p331_p3 = scmp.eq.s32.totalorder %s1496_s26, 1  ;;  %p1497_p5 = scmp.ge.s32.totalorder %s2067_s24, 1 }
  0x15   : > { %p2182_p4 = por %p2634_p1, %p55_p0  ;;  %p338_p7 = scmp.lt.s32.totalorder %s2067_s24, 3 }
  0x16   : > { %p2187_p6 = por %p331_p3, %p55_p0  ;;  %s2069_s30 = smov [#allocation11]  }
  0x17   : > { %s2660_s27 = scalar_select %p2182_p4, 1, 0 }
  0x18   : > { %s2661_s28 = scalar_select %p2187_p6, 1, 0 }
  0x19   : > { %p2192_p8 = pnand %p1497_p5, %p338_p7  ;;  %s350_s13 = sshll.u32 %s2069_s30, 4  ;;  %s2196_s13 = int_to_ptr.vmem [resolvable:$true] %s350_s13 }
  0x1a   : > { %2662 = sst [smem:[#allocation24_spill]] %s2661_s28  ;;  %s2070_s15 = smov [#allocation12]  }
  0x1b   : > { %s2663_s29 = scalar_select %p2192_p8, 1, 0 }
  0x1c   : > { %p1677_p9 = pneg %p2192_p8  ;;  %s372_s16 = sshll.u32 %s2070_s15, 4  ;;  %s2207_s16 = int_to_ptr.vmem [resolvable:$true] %s372_s16 }
  0x1d   : > { %s2665_s4 = sld [smem:[#allocation29_spill]] }
  0x1e   : > { %p2203_p11 = pnand %p1677_p9, %p2634_p1 }
  0x20   : > { %s2664_s14 = scalar_select %p2203_p11, 1, 0 }
  0x21   : > { %p2217_p13 = pneg %p2203_p11 }
  0x23   : > { %s1781_s19 = scalar_lea.hbm %s2665_s4, 256 }
  0x24   : > { %p1782_p12 = scmp.ne.s32.totalorder %s2665_s4, %s1781_s19  ;;  %p1788_p5 = scmp.lt.u32.totalorder %s1781_s19, %s2665_s4 }
  0x25   : > { %s2666_s30 = scalar_select %p2217_p13, 1, 0 }
  0x26   : > { %p1784_p0 = pnand %p2217_p13, %p1782_p12 }
  0x28   : > { %p1785_p3 = pneg %p1784_p0 }
  0x2a   : > { %p1790_p7 = pnand %p1788_p5, %p1785_p3 }
  0x2c   : > { %1793 = shalt.err (!%p1790_p7)
}
  0x2d   : > { %s1794_s17 = scalar_lea.vmem %s2196_s13, 256  ;;  %p1802_p2 = scmp.lt.s32.totalorder %s2196_s13, %s2196_s13 }
  0x2e   : > { %p1795_p9 = scmp.ne.s32.totalorder %s2196_s13, %s1794_s17  ;;  %p1803_p6 = scmp.lt.s32.totalorder %s1794_s17, %s1794_s17 }
  0x30   : > { %p1797_p10 = pnand %p1795_p9, %p2217_p13  ;;  %p1804_p12 = por %p1803_p6, %p1802_p2 }
  0x32   : > { %p1798_p1 = pneg %p1797_p10 }
  0x34   : > { %p1805_p0 = pnand %p1804_p12, %p1798_p1 }
  0x36   : > { %1808 = shalt.err (!%p1805_p0)
}
  0x37   : > { %s2071_s18 = smov 64   ;;  %s2072_s28 = smov 4  }
  0x38   : > { %1680 = dma.hbm_to_vmem [thread:$0]  (!%p2203_p11), %s2665_s4, 256, %s2196_s13, [#allocation10], %s2071_s18, %s2071_s18, %s2072_s28  }
  0x39   : > { %s2667_s8 = sld [smem:[#allocation30_spill]] }
  0x3f   : > { %s1809_s21 = scalar_lea.hbm %s2667_s8, 256 }
  0x40   : > { %p1810_p2 = scmp.ne.s32.totalorder %s2667_s8, %s1809_s21  ;;  %p1816_p10 = scmp.lt.u32.totalorder %s1809_s21, %s2667_s8 }
  0x42   : > { %p1812_p1 = pnand %p1810_p2, %p2217_p13 }
  0x44   : > { %p1813_p6 = pneg %p1812_p1 }
  0x46   : > { %p1818_p3 = pnand %p1816_p10, %p1813_p6 }
  0x48   : > { %1821 = shalt.err (!%p1818_p3)
}
  0x49   : > { %s1822_s13 = scalar_lea.vmem %s2207_s16, 256  ;;  %p1830_p12 = scmp.lt.s32.totalorder %s2207_s16, %s2207_s16 }
  0x4a   : > { %p1823_p5 = scmp.ne.s32.totalorder %s2207_s16, %s1822_s13  ;;  %p1831_p0 = scmp.lt.s32.totalorder %s1822_s13, %s1822_s13 }
  0x4c   : > { %p1825_p7 = pnand %p1823_p5, %p2217_p13  ;;  %p1832_p2 = por %p1831_p0, %p1830_p12 }
  0x4e   : > { %p1826_p9 = pneg %p1825_p7 }
  0x50   : > { %p1833_p1 = pnand %p1832_p2, %p1826_p9 }
  0x52   : > { %1836 = shalt.err (!%p1833_p1)
}
  0x53   : > { %1683 = dma.hbm_to_vmem [thread:$0]  (!%p2203_p11), %s2667_s8, 256, %s2207_s16, [#allocation13], %s2071_s18, %s2071_s18, %s2072_s28  }
  0x54   : > { %s2262_s12 = sadd.s32 1, %s2067_s24   ;;  %s42_s21 = sadd.s32 1, %s2063_s23 }
  0x55   : > { %2668 = sst [smem:[#allocation25_spill]] %s2262_s12  ;;  %s39_s19 = ssub.s32 %s2067_s24, %s2262_s12 }
  0x56   : > { %p49_p6 = scmp.ne.s32.totalorder %s2063_s23, %s2059_s22  ;;  %p40_p10 = scmp.eq.s32.totalorder %s39_s19, 0 }
  0x57   : > { %p50_p3 = scmp.eq.s32.totalorder %s2067_s24, 0  ;;  %p2669_p5 = scmp.eq.s32.totalorder %s2173_s25, 1 }
  0x58   : > { %p1707_p9 = scmp.lt.s32.totalorder %s2067_s24, 2  ;;  %s2281_s15 = sand.u32 1, %s2063_s23  }
  0x59   : > { %p2272_p7 = por %p2669_p5, %p49_p6  ;;  %p51_p12 = por %p50_p3, %p49_p6 }
  0x5a   : > { %s2278_s26 = scalar_select %p40_p10, %s2063_s23, %s42_s21  }
  0x5b   : > { %s2670_s20 = scalar_select %p2272_p7, 1, 0 }
  0x5c   : > { %2672 = sst [smem:[#allocation27_spill]] %s2278_s26  ;;  %s2284_s16 = sshll.u32 %s2281_s15, 3 }
  0x5d   : > { %2671 = sst [smem:[#allocation26_spill]] %s2670_s20  ;;  %s2287_s18 = sshll.u32 %s2067_s24, 7 }
  0x5e   : > { %p2289_p0 = pnand %p1707_p9, %p51_p12  ;;  %s2643_s17 = sand.u32 1, %s2067_s24  }
  0x5f   : > { %s2674_s1 = sld [smem:[#allocation28_spill]]  ;;  %s425_s21 = scalar_lea.vmem [#allocation6], %s2284_s16 }
  0x60   : > { %s2673_s28 = scalar_select %p2289_p0, 1, 0 }
  0x61   : > { %s432_s19 = sshll.u32 %s425_s21, 4  ;;  %s2305_s4 = scalar_lea.sflag [#allocation7], %s2643_s17  ;;  %s2301_s19 = int_to_ptr.vmem [resolvable:$true] %s432_s19 }
  0x62   : > { %p2311_p1 = pneg %p2289_p0 }
  0x65   : > { %s2298_s11 = scalar_lea.hbm %s2674_s1, %s2287_s18  ;;  %s1842_s21 = scalar_lea.hbm %s2674_s1, 256 }
  0x66   : > { %s1837_s8 = scalar_lea.hbm %s2298_s11, 128  ;;  %p1843_p3 = scmp.lt.u32.totalorder %s2298_s11, %s2674_s1 }
  0x67   : > { %p1838_p2 = scmp.ne.s32.totalorder %s2298_s11, %s1837_s8  ;;  %p1844_p5 = scmp.lt.u32.totalorder %s1842_s21, %s1837_s8 }
  0x68   : > { %p1846_p12 = scmp.lt.u32.totalorder %s1837_s8, %s2298_s11 }
  0x69   : > { %p1840_p6 = pnand %p2311_p1, %p1838_p2  ;;  %p1845_p9 = por %p1844_p5, %p1843_p3 }
  0x6b   : > { %p1841_p10 = pneg %p1840_p6  ;;  %p1847_p7 = por %p1846_p12, %p1845_p9 }
  0x6d   : > { %p1848_p4 = pnand %p1847_p7, %p1841_p10 }
  0x6f   : > { %1851 = shalt.err (!%p1848_p4)
}
  0x70   : > { %s1852_s17 = scalar_lea.vmem %s2301_s19, 128  ;;  %s2073_s13 = smov [#allocation6]  }
  0x71   : > { %p1853_p2 = scmp.ne.s32.totalorder %s2301_s19, %s1852_s17  ;;  %s1857_s10 = sshll.u32 %s2073_s13, 4  ;;  %s1858_s10 = int_to_ptr.vmem [resolvable:$false] %s1857_s10 }
  0x72   : > { %s1859_s23 = scalar_lea.vmem %s1858_s10, 256  ;;  %p1860_p11 = scmp.lt.s32.totalorder %s2301_s19, %s1858_s10 }
  0x73   : > { %p1855_p6 = pnand %p1853_p2, %p2311_p1  ;;  %p1861_p13 = scmp.lt.s32.totalorder %s1859_s23, %s1852_s17 }
  0x75   : > { %p1856_p8 = pneg %p1855_p6  ;;  %p1862_p3 = por %p1861_p13, %p1860_p11 }
  0x77   : > { %p1863_p5 = pnand %p1862_p3, %p1856_p8 }
  0x79   : > { %1866 = shalt.err (!%p1863_p5)
}
  0x7a   : > { %1693 = dma.hbm_to_vmem [thread:$0]  (!%p2289_p0), %s2298_s11, 128, %s2301_s19, %s2305_s4  }
  0x7b   : > { %s2074_s8 = smov [#allocation14]   ;;  %s1867_s13 = scalar_lea.hbm %s2629_s9, 16 }
  0x7c   : > { %s386_s12 = sshll.u32 %s2074_s8, 4  ;;  %p1868_p4 = scmp.ne.s32.totalorder %s2629_s9, %s1867_s13  ;;  %s387_s12 = int_to_ptr.vmem [resolvable:$true] %s386_s12 }
  0x7d   : > { %p2676_p8 = scmp.ne.s32.totalorder %s2666_s30, 0  ;;  %p1874_p7 = scmp.lt.u32.totalorder %s1867_s13, %s2629_s9 }
  0x7f   : > { %p1870_p11 = pnand %p1868_p4, %p2676_p8 }
  0x81   : > { %p1871_p13 = pneg %p1870_p11 }
  0x83   : > { %p1876_p10 = pnand %p1874_p7, %p1871_p13 }
  0x85   : > { %1879 = shalt.err (!%p1876_p10)
}
  0x86   : > { %s1880_s11 = scalar_lea.vmem %s387_s12, 16  ;;  %s1887_s1 = scalar_lea.vmem %s387_s12, 32 }
  0x87   : > { %p1881_p9 = scmp.ne.s32.totalorder %s387_s12, %s1880_s11  ;;  %p1888_p6 = scmp.lt.s32.totalorder %s387_s12, %s387_s12 }
  0x88   : > { %p1889_p3 = scmp.lt.s32.totalorder %s1887_s1, %s1880_s11 }
  0x89   : > { %p1883_p12 = pnand %p1881_p9, %p2676_p8 }
  0x8a   : > { %p1890_p5 = por %p1889_p3, %p1888_p6 }
  0x8b   : > { %p1884_p2 = pneg %p1883_p12 }
  0x8d   : > { %p1891_p0 = pnand %p1890_p5, %p1884_p2 }
  0x8f   : > { %1894 = shalt.err (!%p1891_p0)
}
  0x90   : > { %p2677_p4 = scmp.ne.s32.totalorder %s2664_s14, 0  ;;  %s2357_s21 = scalar_lea.hbm %s2620_s0, %s2287_s18 }
  0x91   : > { %s407_s13 = scalar_lea.vmem [#allocation3], %s2284_s16  ;;  %s404_s14 = scalar_lea.sflag [#allocation4], %s2281_s15 }
  0x92   : > { %1686 = dma.hbm_to_vmem [thread:$0]  (!%p2677_p4), %s2629_s9, 16, %s387_s12, [#allocation13]  }
  0x93   : > { %s414_s10 = sshll.u32 %s407_s13, 4  ;;  %s1895_s17 = scalar_lea.hbm %s2357_s21, 128  ;;  %s415_s10 = int_to_ptr.vmem [resolvable:$true] %s414_s10 }
  0x94   : > { %p1896_p0 = scmp.ne.s32.totalorder %s2357_s21, %s1895_s17  ;;  %s1900_s11 = scalar_lea.hbm %s2620_s0, 256 }
  0x95   : > { %p1901_p13 = scmp.lt.u32.totalorder %s2357_s21, %s2620_s0  ;;  %p1902_p7 = scmp.lt.u32.totalorder %s1900_s11, %s1895_s17 }
  0x96   : > { %p1898_p8 = pnand %p1896_p0, %p2311_p1  ;;  %p1904_p9 = scmp.lt.u32.totalorder %s1895_s17, %s2357_s21 }
  0x97   : > { %p1903_p10 = por %p1902_p7, %p1901_p13 }
  0x98   : > { %p1899_p11 = pneg %p1898_p8 }
  0x99   : > { %p1905_p12 = por %p1904_p9, %p1903_p10 }
  0x9b   : > { %p1906_p2 = pnand %p1905_p12, %p1899_p11 }
  0x9d   : > { %1909 = shalt.err (!%p1906_p2)
}
  0x9e   : > { %s1910_s19 = scalar_lea.vmem %s415_s10, 128  ;;  %s2075_s8 = smov [#allocation3]  }
  0x9f   : > { %p1911_p6 = scmp.ne.s32.totalorder %s415_s10, %s1910_s19  ;;  %s1915_s30 = sshll.u32 %s2075_s8, 4  ;;  %s1916_s30 = int_to_ptr.vmem [resolvable:$false] %s1915_s30 }
  0xa0   : > { %s1917_s13 = scalar_lea.vmem %s1916_s30, 256  ;;  %p1918_p4 = scmp.lt.s32.totalorder %s415_s10, %s1916_s30 }
  0xa1   : > { %p1913_p3 = pnand %p1911_p6, %p2311_p1  ;;  %p1919_p0 = scmp.lt.s32.totalorder %s1917_s13, %s1910_s19 }
  0xa3   : > { %p1914_p5 = pneg %p1913_p3  ;;  %p1920_p8 = por %p1919_p0, %p1918_p4 }
  0xa5   : > { %p1921_p7 = pnand %p1920_p8, %p1914_p5 }
  0xa7   : > { %1924 = shalt.err (!%p1921_p7)
}
  0xa8   : > { %p2678_p13 = scmp.ne.s32.totalorder %s2673_s28, 0  ;;  %s2382_s12 = scalar_lea.hbm %s2622_s2, %s2287_s18 }
  0xa9   : > { %s443_s11 = scalar_lea.vmem [#allocation8], %s2284_s16  ;;  %s1508_s20 = sshll.u32 %s2281_s15, 1 }
  0xaa   : > { %1690 = dma.hbm_to_vmem [thread:$0]  (!%p2678_p13), %s2357_s21, 128, %s415_s10, %s404_s14  }
  0xab   : > { %s450_s1 = sshll.u32 %s443_s11, 4  ;;  %s1925_s19 = scalar_lea.hbm %s2382_s12, 128  ;;  %s451_s1 = int_to_ptr.vmem [resolvable:$true] %s450_s1 }
  0xac   : > { %p1926_p11 = scmp.ne.s32.totalorder %s2382_s12, %s1925_s19  ;;  %s1930_s10 = scalar_lea.hbm %s2622_s2, 256 }
  0xad   : > { %p1931_p12 = scmp.lt.u32.totalorder %s2382_s12, %s2622_s2  ;;  %p1932_p2 = scmp.lt.u32.totalorder %s1930_s10, %s1925_s19 }
  0xae   : > { %p1928_p10 = pnand %p1926_p11, %p2311_p1  ;;  %p1934_p3 = scmp.lt.u32.totalorder %s1925_s19, %s2382_s12 }
  0xaf   : > { %p1933_p6 = por %p1932_p2, %p1931_p12 }
  0xb0   : > { %p1929_p9 = pneg %p1928_p10 }
  0xb1   : > { %p1935_p5 = por %p1934_p3, %p1933_p6 }
  0xb3   : > { %p1936_p4 = pnand %p1935_p5, %p1929_p9 }
  0xb5   : > { %1939 = shalt.err (!%p1936_p4)
}
  0xb6   : > { %s1940_s16 = scalar_lea.vmem %s451_s1, 128  ;;  %s2076_s30 = smov [#allocation8]  }
  0xb7   : > { %p1941_p0 = scmp.ne.s32.totalorder %s451_s1, %s1940_s16  ;;  %s1945_s13 = sshll.u32 %s2076_s30, 4  ;;  %s1946_s13 = int_to_ptr.vmem [resolvable:$false] %s1945_s13 }
  0xb8   : > { %s1947_s17 = scalar_lea.vmem %s1946_s13, 256  ;;  %p1948_p11 = scmp.lt.s32.totalorder %s451_s1, %s1946_s13 }
  0xb9   : > { %p1943_p8 = pnand %p1941_p0, %p2311_p1  ;;  %p1949_p10 = scmp.lt.s32.totalorder %s1947_s17, %s1940_s16 }
  0xbb   : > { %p1944_p7 = pneg %p1943_p8  ;;  %p1950_p13 = por %p1949_p10, %p1948_p11 }
  0xbd   : > { %p1951_p2 = pnand %p1950_p13, %p1944_p7 }
  0xbf   : > { %1954 = shalt.err (!%p1951_p2)
}
  0xc0   : > { %p2679_p12 = scmp.ne.s32.totalorder %s2673_s28, 0  ;;  %s1509_s23 = sshll.u32 %s2067_s24, 5 }
  0xc1   : > { %s2408_s8 = scalar_lea.hbm %s2623_s3, %s1509_s23  ;;  %s461_s21 = scalar_lea.vmem [#allocation9], %s1508_s20 }
  0xc2   : > { %1696 = dma.hbm_to_vmem [thread:$0]  (!%p2679_p12), %s2382_s12, 128, %s451_s1, %s2305_s4  }
  0xc3   : > { %s468_s10 = sshll.u32 %s461_s21, 4  ;;  %s2680_s14 = sand.u32 1, %s2067_s24   ;;  %s469_s10 = int_to_ptr.vmem [resolvable:$true] %s468_s10 }
  0xc4   : > { %s458_s18 = scalar_lea.sflag [#allocation10], %s2680_s14  ;;  %s1955_s16 = scalar_lea.hbm %s2408_s8, 32 }
  0xc5   : > { %p1956_p13 = scmp.ne.s32.totalorder %s2408_s8, %s1955_s16  ;;  %s1960_s1 = scalar_lea.hbm %s2623_s3, 64 }
  0xc6   : > { %p1961_p3 = scmp.lt.u32.totalorder %s2408_s8, %s2623_s3  ;;  %p1962_p5 = scmp.lt.u32.totalorder %s1960_s1, %s1955_s16 }
  0xc7   : > { %p1958_p9 = pnand %p1956_p13, %p2311_p1  ;;  %p1964_p0 = scmp.lt.u32.totalorder %s1955_s16, %s2408_s8 }
  0xc8   : > { %p1963_p4 = por %p1962_p5, %p1961_p3 }
  0xc9   : > { %p1959_p6 = pneg %p1958_p9 }
  0xca   : > { %p1965_p8 = por %p1964_p0, %p1963_p4 }
  0xcc   : > { %p1966_p7 = pnand %p1965_p8, %p1959_p6 }
  0xce   : > { %1969 = shalt.err (!%p1966_p7)
}
  0xcf   : > { %s1970_s20 = scalar_lea.vmem %s469_s10, 32  ;;  %s2077_s13 = smov [#allocation9]  }
  0xd0   : > { %p1971_p11 = scmp.ne.s32.totalorder %s469_s10, %s1970_s20  ;;  %s1975_s17 = sshll.u32 %s2077_s13, 4  ;;  %s1976_s17 = int_to_ptr.vmem [resolvable:$false] %s1975_s17 }
  0xd1   : > { %s1977_s23 = scalar_lea.vmem %s1976_s17, 64  ;;  %p1978_p13 = scmp.lt.s32.totalorder %s469_s10, %s1976_s17 }
  0xd2   : > { %p1973_p10 = pnand %p1971_p11, %p2311_p1  ;;  %p1979_p9 = scmp.lt.s32.totalorder %s1977_s23, %s1970_s20 }
  0xd4   : > { %p1974_p2 = pneg %p1973_p10  ;;  %p1980_p12 = por %p1979_p9, %p1978_p13 }
  0xd6   : > { %p1981_p3 = pnand %p1980_p12, %p1974_p2 }
  0xd8   : > { %1984 = shalt.err (!%p1981_p3)
}
  0xd9   : > { %p2681_p5 = scmp.ne.s32.totalorder %s2673_s28, 0  ;;  %p2682_p6 = scmp.ne.s32.totalorder %s2663_s29, 0 }
  0xda   : > { %s2434_s26 = sand.u32 (!%p2682_p6), 1, %s2059_s22   ;;  %p2683_p1 = scmp.ne.s32.totalorder (!%p2682_p6), %s2660_s27, 0 }
  0xdb   : > { %1699 = dma.hbm_to_vmem [thread:$0]  (!%p2681_p5), %s2408_s8, 32, %s469_s10, %s458_s18  }
  0xdc   : > { %477 = sbr.rel (%p2682_p6) target bundleno = 1702 (0x6a6), region = 68  ;;  %s2437_s11 = sshll.u32 (!%p2682_p6), %s2434_s26, 3 }
  0xdd   : > { %s480_s19 = scalar_lea.sflag (!%p2682_p6), [#allocation4], %s2434_s26  ;;  %s483_s21 = scalar_lea.vmem (!%p2682_p6), [#allocation3], %s2437_s11 }
  0xe3   : > { %2030 = dma.done.wait (%p2683_p1), %s480_s19, 128  }
  0xe4   : > { %2032 = vsyncadd (%p2683_p1), %s480_s19, 4294967168  ;;  %s488_s29 = sand.u32 1, %s2173_s25   ;;  %s492_s8 = scalar_lea.vmem [#allocation6], %s2437_s11 }
  0xe5   : > { %s489_s28 = scalar_lea.sflag [#allocation7], %s488_s29 }
  0xe6   : > { %2034 = dma.done.wait (%p2683_p1), %s489_s28, 256  }
  0xe7   : > { %2036 = vsyncadd (%p2683_p1), %s489_s28, 4294967040  ;;  %s1514_s10 = sshll.u32 %s2434_s26, 1  ;;  %s501_s14 = scalar_lea.vmem [#allocation8], %s2437_s11 }
  0xe8   : > { %s507_s18 = scalar_lea.sflag [#allocation10], %s488_s29  ;;  %s2453_s16 = scalar_lea.vmem [#allocation9], %s1514_s10 }
  0xe9   : > { %2038 = dma.done.wait (%p2683_p1), %s507_s18, 32  }
  0xea   : > { %2040 = vsyncadd (%p2683_p1), %s507_s18, 4294967264  ;;  %p2684_p12 = scmp.eq.s32.totalorder %s2173_s25, 0 }
  0xec   : > { %2042 = dma.done.wait (%p2684_p12), [#allocation10], 256   ;;  %p2685_p4 = pmov %p2684_p12 }
  0xee   : > { %2044 = vsyncadd (%p2685_p4), [#allocation10], 4294967040  ;;  %p2686_p0 = pmov %p2685_p4 }
  0xf0   : > { %2046 = dma.done.wait (%p2686_p0), [#allocation13], 272   ;;  %p2687_p8 = pmov %p2686_p0 }
  0xf1   : > { %v2078_v0 = vmov 0.0   ;;  %vm2079_vm0 = vmmov 0   ;;  %v1757_v1 = vld [vmem:[%s2626_s6] sm:$0xff]   ;;  %v1759_v3 = vld [vmem:[%s2626_s6 + $0x8] sm:$0xff]   ;;  %vm608_vm1 = vcmask 261120   ;;  %vm791_vm2 = vcmask 64512  }
  0xf2   : > { %2048 = vsyncadd (%p2687_p8), [#allocation13], 4294967024  ;;  %1583 = vmatprep.subr.bf16.mxu1 %v2078_v0  ;;  %1575 = vmatprep.subr.bf16.mxu0 %v2078_v0  ;;  %v1758_v2 = vld [vmem:[#allocation11] sm:$0xff]   ;;  %v1760_v5 = vld [vmem:[#allocation11 + $0x8] sm:$0xff]   ;;  %s2080_s17 = smov 112   ;;  %s2081_s23 = smov 120  }
  0xf3   : > { %1587 = vmatprep.mubr.msk.bf16.mxu1 %vm2079_vm0, %v2078_v0  ;;  %1579 = vmatprep.mubr.msk.bf16.mxu0 %vm2079_vm0, %v2078_v0  ;;  %v581_v4 = vld [vmem:[%s492_s8] sm:$0xff]  ;;  %v579_v6 = vld [vmem:[%s483_s21] sm:$0xff]  ;;  %s2082_s19 = smov 104   ;;  %vm853_vm3 = vcmask 1043456   ;;  %s2083_s21 = smov 8   ;;  %vm1015_vm4 = vcmask 130112  }
  0xf4   : > { %1584 = vmatpush3.bf16.msra.mxu1 %v1757_v1  ;;  %1576 = vmatpush3.bf16.msra.mxu0 %v1758_v2  ;;  %v582_v7 = vpack.c.bf16 %v581_v4, %v581_v4  ;;  %v580_v8 = vpack.c.bf16 %v579_v6, %v579_v6  ;;  %v1523_v9 = vld [vmem:[%s2627_s7] ss:$0 sm:$0xff]  ;;  %v1761_v24 = vld [vmem:[#allocation12] sm:$0xff]   ;;  %v1762_v25 = vld [vmem:[#allocation12 + $0x8] sm:$0xff]   ;;  %s2688_s8 = sld [smem:[#allocation31_spill]]  ;;  %s2084_s18 = smov 16  }
  0xf5   : > { %1585 = vmatprep.subr.bf16.mxu1 %v2078_v0  ;;  %1577 = vmatprep.subr.bf16.mxu0 %v2078_v0  ;;  %v1519_v10 = vld [vmem:[%s2625_s5] ss:$0 sm:$0xff]  ;;  %v583_v26 = vld [vmem:[%s501_s14] sm:$0xff]  ;;  %v784_v37 = vld [vmem:[%s2453_s16] sm:$0x3]  ;;  %s2085_s16 = smov 24  }
  0xf6   : > { %v584_v27 = vpack.c.bf16 %v583_v26, %v583_v26  ;;  %v785_v38 = vunpack.c.0.s8 %v784_v37  ;;  %v1527_v47 = vld [vmem:[#allocation14] ss:$0 sm:$0xff]  ;;  %vm1131_vm5 = vcmask 195712   ;;  %vm1247_vm6 = vcmask 261312   ;;  %s2689_s12 = sld [smem:[#allocation32_spill]]  ;;  %s2690_s1 = sld [smem:[#allocation26_spill]] }
  0xf7   : > { %s1544_s30 = sshll.u32 %s2173_s25, 7  ;;  %s577_s15 = scalar_lea.vmem [#allocation15], %s2437_s11 }
  0xf8   : > { %1586 = vmatpush3.bf16.msra.mxu1 %v1759_v3  ;;  %1578 = vmatpush3.bf16.msra.mxu0 %v1760_v5  ;;  %v786_v39 = vcvt.s32.f32 %v785_v38  ;;  %s1332_s20 = sshll.u32 %s577_s15, 4  ;;  %s1319_s29 = scalar_lea.sflag [#allocation5], %s2434_s26  ;;  %s2578_s20 = int_to_ptr.vmem [resolvable:$true] %s1332_s20 }
  0xf9   : > { %1599 = vmatprep.subr.bf16.mxu1 %v2078_v0  ;;  %1591 = vmatprep.subr.bf16.mxu0 %v2078_v0  ;;  %s1985_s25 = scalar_lea.vmem %s2578_s20, 128  ;;  %s2086_s11 = smov [#allocation15]  }
  0xfa   : > { %v787_v40 = vmul.f32 -1e+10, %v786_v39  ;;  %p1986_p7 = scmp.ne.s32.totalorder %s2578_s20, %s1985_s25  ;;  %s1989_s28 = sshll.u32 %s2086_s11, 4  ;;  %s1990_s28 = int_to_ptr.vmem [resolvable:$false] %s1989_s28 }
  0xfb   : > { %1588 = vmatmul.mubr.msk.bf16.vlgmr.msra.gmra.mrb[0].mxu1 %vm608_vm1, %v582_v7  ;;  %1580 = vmatmul.mubr.msk.bf16.vlgmr.msra.gmra.mrb[0].mxu0 %vm608_vm1, %v580_v8  ;;  %s1991_s10 = scalar_lea.vmem %s1990_s28, 256  ;;  %p1992_p13 = scmp.lt.s32.totalorder %s2578_s20, %s1990_s28 }
  0xfc   : > { %1601 = vmatprep.mubr.msk.bf16.mxu1 %vm2079_vm0, %v2078_v0  ;;  %1595 = vmatprep.mubr.msk.bf16.mxu0 %vm2079_vm0, %v2078_v0  ;;  %p2693_p11 = scmp.ne.s32.totalorder %s2690_s1, 0  ;;  %p1993_p9 = scmp.lt.s32.totalorder %s1991_s10, %s1985_s25 }
  0xfd   : > { %1592 = vmatpush3.bf16.msra.mxu0 %v1761_v24 }
  0xfe   : > { %1593 = vmatprep.subr.bf16.mxu0 %v2078_v0  ;;  %p1987_p10 = pnand %p1986_p7, %p2693_p11  ;;  %p1994_p3 = por %p1993_p9, %p1992_p13 }
 0x100   : > { %p1988_p2 = pneg %p1987_p10 }
 0x101   : > { %1594 = vmatpush3.bf16.msra.mxu0 %v1762_v25 }
 0x102   : > { %1605 = vmatprep.subr.bf16.mxu0 %v2078_v0  ;;  %p1995_p5 = pnand %p1994_p3, %p1988_p2 }
 0x104   : > { %1596 = vmatmul.mubr.msk.bf16.vlgmr.msra.gmra.mrb[4].mxu0 %vm608_vm1, %v584_v27 }
 0x105   : > { %1607 = vmatprep.mubr.msk.bf16.mxu0 %vm2079_vm0, %v2078_v0 }
 0x1ce   : > { %v712_v11 = vpop.f32.mrb[0].mxu1  ;;  %v646_v14 = vpop.f32.mrb[0].mxu0 }
 0x1cf   : > { %v713_v12 = vadd.f32 %v1523_v9, %v712_v11  ;;  %v1589_v13 = vpop.f32.mrb[1].mxu1  ;;  %v647_v16 = vadd.f32 %v1519_v10, %v646_v14  ;;  %v1581_v17 = vpop.f32.mrb[1].mxu0 }
 0x1d0   : > { %v715_v15 = vpop.f32.mrb[2].mxu1  ;;  %v649_v20 = vpop.f32.mrb[2].mxu0 }
 0x1d1   : > { %v789_v18 = vpack.c.bf16 %v713_v12, %v713_v12  ;;  %v1590_v19 = vpop.f32.mrb[3].mxu1  ;;  %v1582_v21 = vpop.f32.mrb[3].mxu0  ;;  %v788_v22 = vpack.c.bf16 %v647_v16, %v647_v16 }
 0x1d3   : > { %1019 = vrot.lane.b32.xlu1 %v789_v18, %s2080_s17  ;;  %902 = vrot.lane.b32.xlu0 %v789_v18, %s2081_s23  ;;  %v796_v23 = vsel %vm791_vm2, %v789_v18, 0 }
 0x1d4   : > { %1600 = vmatpush3.bf16.xpose.msra.mxu1 %v796_v23 }
 0x1d5   : > { %1611 = vmatprep.subr.bf16.mxu1 %v2078_v0 }
 0x1d7   : > { %1017 = vrot.lane.b32.xlu1 %v788_v22, %s2080_s17  ;;  %899 = vrot.lane.b32.xlu0 %v788_v22, %s2081_s23  ;;  %v778_v48 = vpop.f32.mrb[4].mxu0 }
 0x1d8   : > { %v779_v49 = vadd.f32 %v1527_v47, %v778_v48  ;;  %v1597_v50 = vpop.f32.mrb[5].mxu0 }
 0x1d9   : > { %v781_v51 = vpop.f32.mrb[6].mxu0 }
 0x1da   : > { %v790_v52 = vpack.c.bf16 %v779_v49, %v779_v49  ;;  %v1598_v53 = vpop.f32.mrb[7].mxu0 }
 0x1db   : > { %1133 = vrot.lane.b32.xlu1 %v788_v22, %s2082_s19  ;;  %1135 = vrot.lane.b32.xlu0 %v789_v18, %s2082_s19 }
 0x1dc   : > { %1602 = vmatmul.mubr.msk.bf16.vlgmr.msra.gmra.mrb[4].mxu1 %vm791_vm2, %v788_v22  ;;  %v855_v54 = vsel %vm853_vm3, %v790_v52, 0 }
 0x1dd   : > { %1613 = vmatprep.mubr.msk.bf16.mxu1 %vm2079_vm0, %v2078_v0  ;;  %1606 = vmatpush3.bf16.msra.mxu0 %v855_v54 }
 0x1de   : > { %1617 = vmatprep.subr.bf16.mxu0 %v2078_v0 }
 0x245   : > { %v903_v28 = vpop.permute.xlu0 %902  ;;  %v1020_v30 = vpop.permute.xlu1 %1019 }
 0x246   : > { %v908_v29 = vsel %vm791_vm2, %v903_v28, 0  ;;  %v1025_v32 = vsel %vm791_vm2, %v1020_v30, 0 }
 0x247   : > { %1612 = vmatpush3.bf16.xpose.msra.mxu1 %v908_v29 }
 0x248   : > { %1623 = vmatprep.subr.bf16.mxu1 %v2078_v0 }
 0x249   : > { %v900_v31 = vpop.permute.xlu0 %899  ;;  %v1018_v34 = vpop.permute.xlu1 %1017 }
 0x24d   : > { %v1136_v33 = vpop.permute.xlu0 %1135  ;;  %v1134_v36 = vpop.permute.xlu1 %1133 }
 0x24e   : > { %1614 = vmatmul.mubr.msk.bf16.vlgmr.msra.gmra.mrb[8].mxu1 %vm791_vm2, %v900_v31  ;;  %v1141_v35 = vsel %vm791_vm2, %v1136_v33, 0 }
 0x24f   : > { %1624 = vmatpush3.bf16.xpose.msra.mxu1 %v1025_v32  ;;  %1625 = vmatprep.mubr.msk.bf16.mxu1 %vm2079_vm0, %v2078_v0 }
 0x250   : > { %1635 = vmatprep.subr.bf16.mxu1 %v2078_v0 }
 0x256   : > { %1626 = vmatmul.mubr.msk.bf16.vlgmr.msra.gmra.mrb[12].mxu1 %vm791_vm2, %v1018_v34 }
 0x257   : > { %1636 = vmatpush3.bf16.xpose.msra.mxu1 %v1141_v35  ;;  %1637 = vmatprep.mubr.msk.bf16.mxu1 %vm2079_vm0, %v2078_v0 }
 0x258   : > { %1647 = vmatprep.subr.bf16.mxu1 %v2078_v0 }
 0x25e   : > { %1638 = vmatmul.mubr.msk.bf16.vlgmr.msra.gmra.mrb[16].mxu1 %vm791_vm2, %v1134_v36 }
 0x25f   : > { %1651 = vmatprep.mubr.msk.bf16.mxu1 %vm2079_vm0, %v2078_v0 }
 0x2af   : > { %v832_v41 = vpop.f32.mrb[4].mxu1 }
 0x2b0   : > { %v833_v42 = vadd.f32 %v832_v41, %v787_v40  ;;  %v1603_v43 = vpop.f32.mrb[5].mxu1 }
 0x2b1   : > { %v835_v44 = vpop.f32.mrb[6].mxu1 }
 0x2b2   : > { %v1604_v45 = vpop.f32.mrb[7].mxu1  ;;  %v838_v46 = vsel %vm791_vm2, %v833_v42, -inf }
 0x2b3   : > { %839 = vmax.xlane.f32.xlu0 %v838_v46 }
 0x321   : > { %v944_v55 = vpop.f32.mrb[8].mxu1 }
 0x322   : > { %v945_v56 = vadd.f32 %v944_v55, %v787_v40  ;;  %v1615_v57 = vpop.f32.mrb[9].mxu1 }
 0x323   : > { %v947_v58 = vpop.f32.mrb[10].mxu1 }
 0x324   : > { %v1616_v59 = vpop.f32.mrb[11].mxu1  ;;  %v950_v60 = vsel %vm791_vm2, %v945_v56, -inf }
 0x325   : > { %951 = vmax.xlane.f32.xlu1 %v950_v60  ;;  %v1763_v60 = vld [vmem:[%s2688_s8] sm:$0xff]  }
 0x326   : > { %1648 = vmatpush3.bf16.msra.mxu1 %v1763_v60 }
 0x327   : > { %1649 = vmatprep.subr.bf16.mxu1 %v2078_v0 }
 0x329   : > { %v1061_v61 = vpop.f32.mrb[12].mxu1 }
 0x32a   : > { %v1062_v62 = vadd.f32 %v1061_v61, %v787_v40  ;;  %v1627_v63 = vpop.f32.mrb[13].mxu1  ;;  %v1764_v61 = vld [vmem:[%s2688_s8 + $0x8] sm:$0xff]  }
 0x32b   : > { %v1064_v1 = vpop.f32.mrb[14].mxu1  ;;  %1650 = vmatpush3.bf16.msra.mxu1 %v1764_v61 }
 0x32c   : > { %v1628_v2 = vpop.f32.mrb[15].mxu1  ;;  %v1067_v3 = vsel %vm791_vm2, %v1062_v62, -inf }
 0x32d   : > { %1068 = vmax.xlane.f32.xlu0 %v1067_v3 }
 0x331   : > { %v1177_v4 = vpop.f32.mrb[16].mxu1 }
 0x332   : > { %v1178_v5 = vadd.f32 %v1177_v4, %v787_v40  ;;  %v1639_v6 = vpop.f32.mrb[17].mxu1 }
 0x333   : > { %v1180_v7 = vpop.f32.mrb[18].mxu1 }
 0x334   : > { %v1640_v8 = vpop.f32.mrb[19].mxu1  ;;  %v1183_v9 = vsel %vm791_vm2, %v1178_v5, -inf }
 0x335   : > { %1184 = vmax.xlane.f32.xlu0 %v1183_v9 }
 0x340   : > { %v840_v10 = vpop.xlane.xlu0 %839 }
 0x341   : > { %v841_v11 = vsub.f32 %v833_v42, %v840_v10 }
 0x343   : > { %v842_v12 = vmul.f32 1.442695, %v841_v11  ;;  %v1539_v11 = vld [vmem:[%s2689_s12] ss:$0 sm:$0xff] }
 0x345   : > { %1765 = vpow2.f32 %v842_v12 }
 0x34f   : > { %v1766_v13 = vpop.eup %1765 }
 0x350   : > { %v844_v14 = vsel %vm791_vm2, %v1766_v13, 0.0 }
 0x351   : > { %845 = vadd.xlane.f32.xlu1 %v844_v14 }
 0x362   : > { %963 = vrot.lane.b32.xlu1 %v790_v52, %s2081_s23  ;;  %s2691_s23 = sld [smem:[#allocation33_spill]] }
 0x3b2   : > { %v952_v15 = vpop.xlane.xlu1 %951 }
 0x3b3   : > { %v953_v16 = vsub.f32 %v945_v56, %v952_v15 }
 0x3b5   : > { %v954_v17 = vmul.f32 1.442695, %v953_v16 }
 0x3b7   : > { %1767 = vpow2.f32 %v954_v17 }
 0x3ba   : > { %v1069_v18 = vpop.xlane.xlu0 %1068 }
 0x3bb   : > { %v1070_v19 = vsub.f32 %v1062_v62, %v1069_v18 }
 0x3bd   : > { %v1071_v20 = vmul.f32 1.442695, %v1070_v19 }
 0x3bf   : > { %1769 = vpow2.f32 %v1071_v20 }
 0x3c1   : > { %v1768_v21 = vpop.eup %1767 }
 0x3c2   : > { %v1185_v22 = vpop.xlane.xlu0 %1184  ;;  %v956_v23 = vsel %vm791_vm2, %v1768_v21, 0.0 }
 0x3c3   : > { %v1186_v24 = vsub.f32 %v1178_v5, %v1185_v22  ;;  %957 = vadd.xlane.f32.xlu0 %v956_v23 }
 0x3c5   : > { %v1187_v25 = vmul.f32 1.442695, %v1186_v24 }
 0x3c7   : > { %1771 = vpow2.f32 %v1187_v25 }
 0x3c9   : > { %v1770_v26 = vpop.eup %1769 }
 0x3ca   : > { %v1073_v27 = vsel %vm791_vm2, %v1770_v26, 0.0 }
 0x3cb   : > { %1074 = vadd.xlane.f32.xlu1 %v1073_v27 }
 0x3d1   : > { %v1772_v28 = vpop.eup %1771 }
 0x3d2   : > { %v1189_v29 = vsel %vm791_vm2, %v1772_v28, 0.0 }
 0x3d3   : > { %1190 = vadd.xlane.f32.xlu0 %v1189_v29 }
 0x3dc   : > { %1195 = vrot.lane.b32.xlu1 %v790_v52, %s2082_s19  ;;  %s2692_s19 = smov %s2691_s23 }
 0x3de   : > { %v846_v30 = vpop.xlane.xlu1 %845 }
 0x3df   : > { %1773 = vrcp.f32 %v846_v30 }
 0x3e2   : > { %v964_v32 = vpop.permute.xlu1 %963 }
 0x3e3   : > { %v969_v35 = vsel %vm853_vm3, %v964_v32, 0 }
 0x3e9   : > { %v1774_v31 = vpop.eup %1773  ;;  %1079 = vrot.lane.b32.xlu0 %v790_v52, %s2080_s17 }
 0x3ea   : > { %v848_v33 = vmul.f32 %v1774_v31, %v1766_v13 }
 0x3ec   : > { %v849_v34 = vpack.c.bf16 %v848_v33, %v848_v33 }
 0x3ee   : > { %1608 = vmatmul.mubr.msk.bf16.vlgmr.msra.gmra.mrb[8].mxu0 %vm791_vm2, %v849_v34 }
 0x3ef   : > { %1618 = vmatpush3.bf16.msra.mxu0 %v969_v35  ;;  %1619 = vmatprep.mubr.msk.bf16.mxu0 %vm2079_vm0, %v2078_v0 }
 0x3f0   : > { %1629 = vmatprep.subr.bf16.mxu0 %v2078_v0 }
 0x450   : > { %v958_v36 = vpop.xlane.xlu0 %957 }
 0x451   : > { %1775 = vrcp.f32 %v958_v36 }
 0x458   : > { %v1075_v37 = vpop.xlane.xlu1 %1074 }
 0x459   : > { %1777 = vrcp.f32 %v1075_v37 }
 0x45b   : > { %v1776_v38 = vpop.eup %1775 }
 0x45c   : > { %v960_v39 = vmul.f32 %v1776_v38, %v1768_v21  ;;  %v1196_v46 = vpop.permute.xlu1 %1195 }
 0x45d   : > { %v1201_v48 = vsel %vm853_vm3, %v1196_v46, 0 }
 0x45e   : > { %v961_v40 = vpack.c.bf16 %v960_v39, %v960_v39 }
 0x460   : > { %v1191_v41 = vpop.xlane.xlu0 %1190  ;;  %1620 = vmatmul.mubr.msk.bf16.vlgmr.msra.gmra.mrb[12].mxu0 %vm791_vm2, %v961_v40 }
 0x461   : > { %1779 = vrcp.f32 %v1191_v41  ;;  %1631 = vmatprep.mubr.msk.bf16.mxu0 %vm2079_vm0, %v2078_v0 }
 0x463   : > { %v1778_v42 = vpop.eup %1777 }
 0x464   : > { %v1077_v43 = vmul.f32 %v1778_v42, %v1770_v26  ;;  %v1080_v44 = vpop.permute.xlu0 %1079 }
 0x465   : > { %v1085_v45 = vsel %vm853_vm3, %v1080_v44, 0 }
 0x466   : > { %1630 = vmatpush3.bf16.msra.mxu0 %v1085_v45  ;;  %v1078_v47 = vpack.c.bf16 %v1077_v43, %v1077_v43 }
 0x467   : > { %1641 = vmatprep.subr.bf16.mxu0 %v2078_v0 }
 0x469   : > { %1632 = vmatmul.mubr.msk.bf16.vlgmr.msra.gmra.mrb[16].mxu0 %vm791_vm2, %v1078_v47 }
 0x46a   : > { %1642 = vmatpush3.bf16.msra.mxu0 %v1201_v48  ;;  %1643 = vmatprep.mubr.msk.bf16.mxu0 %vm2079_vm0, %v2078_v0 }
 0x46b   : > { %v1780_v49 = vpop.eup %1779 }
 0x46c   : > { %v1193_v50 = vmul.f32 %v1780_v49, %v1772_v28 }
 0x46e   : > { %v1194_v51 = vpack.c.bf16 %v1193_v50, %v1193_v50 }
 0x471   : > { %1644 = vmatmul.mubr.msk.bf16.vlgmr.msra.gmra.mrb[20].mxu0 %vm791_vm2, %v1194_v51 }
 0x4c1   : > { %v891_v52 = vpop.f32.mrb[8].mxu0 }
 0x4c2   : > { %897 = vst.msk [vmem:[#allocation2] sm:$0xff] %vm791_vm2, %v891_v52  ;;  %v1609_v53 = vpop.f32.mrb[9].mxu0 }
 0x4c3   : > { %v894_v54 = vpop.f32.mrb[10].mxu0 }
 0x4c4   : > { %v1610_v55 = vpop.f32.mrb[11].mxu0 }
 0x533   : > { %v1005_v56 = vpop.f32.mrb[12].mxu0 }
 0x534   : > { %1012 = vrot.lane.b32.xlu1 %v1005_v56, %s2083_s21  ;;  %v1621_v57 = vpop.f32.mrb[13].mxu0  ;;  %s2576_s21 = scalar_lea.hbm %s2691_s23, %s1544_s30 }
 0x535   : > { %v1008_v58 = vpop.f32.mrb[14].mxu0 }
 0x536   : > { %v1622_v59 = vpop.f32.mrb[15].mxu0 }
 0x53c   : > { %v1121_v62 = vpop.f32.mrb[16].mxu0 }
 0x53d   : > { %1128 = vrot.lane.b32.xlu0 %v1121_v62, %s2084_s18  ;;  %v1633_v63 = vpop.f32.mrb[17].mxu0 }
 0x53e   : > { %v1124_v1 = vpop.f32.mrb[18].mxu0 }
 0x53f   : > { %v1634_v2 = vpop.f32.mrb[19].mxu0 }
 0x544   : > { %v1237_v3 = vpop.f32.mrb[20].mxu0 }
 0x545   : > { %1244 = vrot.lane.b32.xlu1 %v1237_v3, %s2085_s16  ;;  %v1645_v4 = vpop.f32.mrb[21].mxu0 }
 0x546   : > { %v1240_v5 = vpop.f32.mrb[22].mxu0 }
 0x547   : > { %v1646_v6 = vpop.f32.mrb[23].mxu0 }
 0x5a6   : > { %v1013_v7 = vpop.permute.xlu1 %1012 }
 0x5a7   : > { %1016 = vst.msk [vmem:[#allocation2] sm:$0xff] %vm1015_vm4, %v1013_v7 }
 0x5af   : > { %v1129_v0 = vpop.permute.xlu0 %1128 }
 0x5b0   : > { %1132 = vst.msk [vmem:[#allocation2] sm:$0xff] %vm1131_vm5, %v1129_v0 }
 0x5b7   : > { %v1245_v8 = vpop.permute.xlu1 %1244 }
 0x5b8   : > { %1248 = vst.msk [vmem:[#allocation2] sm:$0xff] %vm1247_vm6, %v1245_v8 }
 0x5bf   : > { %v1249_v9 = vld [vmem:[#allocation2] sm:$0xff] }
 0x5c0   : > { %v1250_v10 = vpack.c.bf16 %v1249_v9, %v1249_v9 }
 0x5c2   : > { %1652 = vmatmul.mubr.msk.bf16.vlgmr.msra.gmra.mrb[20].mxu1 %vm608_vm1, %v1250_v10 }
 0x695   : > { %v1311_v12 = vpop.f32.mrb[20].mxu1 }
 0x696   : > { %v1312_v13 = vadd.f32 %v1539_v11, %v1311_v12  ;;  %v1653_v14 = vpop.f32.mrb[21].mxu1 }
 0x697   : > { %v1314_v15 = vpop.f32.mrb[22].mxu1 }
 0x698   : > { %1317 = vst [vmem:[%s577_s15] sm:$0xff] %v1312_v13  ;;  %v1654_v16 = vpop.f32.mrb[23].mxu1 }
 0x699   : > { %1998 = shalt.err (!%p1995_p5)
}
 0x69a   : > { %s1999_s26 = scalar_lea.hbm %s2576_s21, 128  ;;  %s2003_s16 = scalar_lea.hbm %s2692_s19, 256 }
 0x69b   : > { %p2000_p6 = scmp.ne.s32.totalorder %s2576_s21, %s1999_s26  ;;  %p2004_p4 = scmp.lt.u32.totalorder %s2576_s21, %s2692_s19 }
 0x69c   : > { %p2005_p0 = scmp.lt.u32.totalorder %s2003_s16, %s1999_s26  ;;  %p2007_p7 = scmp.lt.u32.totalorder %s1999_s26, %s2576_s21 }
 0x69d   : > { %p2001_p1 = pnand %p2000_p6, %p2693_p11 }
 0x69e   : > { %p2006_p8 = por %p2005_p0, %p2004_p4 }
 0x69f   : > { %p2002_p12 = pneg %p2001_p1 }
 0x6a0   : > { %p2008_p10 = por %p2007_p7, %p2006_p8 }
 0x6a2   : > { %p2009_p2 = pnand %p2008_p10, %p2002_p12 }
 0x6a4   : > { %2012 = shalt.err (!%p2009_p2)
}
 0x6a5   : > { %1675 = dma.vmem_to_hbm [thread:$0]  (%p2693_p11), %s2578_s20, 128, %s2576_s21, %s1319_s29  }
 0x6a6 PF: > { %s2694_s12 = sld [smem:[#allocation22_spill]]  ;;  %s2695_s30 = sld [smem:[#allocation24_spill]] }
 0x6a7   : > { %p2697_p9 = scmp.ge.s32.totalorder %s2067_s24, 2 }
 0x6ac   : > { %s1344_s15 = sand.u32 1, %s2694_s12   ;;  %p2696_p13 = scmp.ne.s32.totalorder %s2695_s30, 0 }
 0x6ad   : > { %s1345_s13 = scalar_lea.sflag [#allocation5], %s1344_s15 }
 0x6ae   : > { %p1701_p3 = pnand %p2697_p9, %p2696_p13 }
 0x6b0   : > { %2050 = dma.done.wait (!%p1701_p3), %s1345_s13, 128  }
 0x6b1   : > { %2052 = vsyncadd (!%p1701_p3), %s1345_s13, 4294967168  ;;  %s2698_s24 = sld [smem:[#allocation25_spill]]  ;;  %s2699_s17 = sld [smem:[#allocation23_spill]] }
 0x6b2   : > { %s2700_s23 = sld [smem:[#allocation27_spill]]  ;;  %s2701_s21 = smov %s2059_s22 }
 0x6b7   : > { %p32_p5 = scmp.ge.s32.totalorder %s2698_s24, 4   ;;  %s2702_s22 = smov %s2699_s17 }
 0x6b9   :  { %34 = sbr.rel (!%p32_p5) target bundleno = 17 (0x11), region = 162 }
 0x6c0   :  { %1350 = vsyncpa [#allocation4], 1 }
 0x6c1   :  { %1352 = vsyncpa [#allocation4 + $0x1], 1 }
 0x6c2   :  { %1353 = vsyncpa [#allocation7], 1 }
 0x6c3   :  { %1355 = vsyncpa [#allocation7 + $0x1], 1 }
 0x6c4   :  { %1356 = vsyncpa [#allocation10], 1 }
 0x6c5   :  { %1358 = vsyncpa [#allocation10 + $0x1], 1 }
 0x6c6   :  { %1359 = vsyncpa [#allocation13], 1 }
 0x6c7   :  { %1360 = vsyncpa [#allocation5], 1 }
 0x6c8   :  { %1362 = vsyncpa [#allocation5 + $0x1], 1 }

</bundles_post_ra>
